<compile_context>
chip_gen: v5e
topology: v5e:2x2
jax: 0.10.0
libtpu: 0.0.40
codegen_flags: <defaults>
</compile_context>

<pallas_src>
import functools

import numpy as np
import jax
import jax.numpy as jnp
from jax.experimental import pallas as pl
from jax.experimental.pallas import tpu as pltpu


# ----------------------------------------------------------------------------
# Plan building + weight packing
# ----------------------------------------------------------------------------
def _build_plan(params, kernel_size, bb, seq_len):
    """Walk the network once and emit:
       plan  : static op descriptors consumed by the kernel factory
       mats  : 2-D f32 matrices (conv weights with bias column, skip stacked
               under conv1, pool selection matrices, final linear) to pack
       c_max : widest channel count (sizes the padded-activation scratch)
    """
    K = kernel_size
    pad = K // 2
    mats, plan = [], []
    c_max = 0

    def add_mat(m):
        mats.append(jnp.asarray(m, jnp.float32))
        return len(mats) - 1

    def conv_aug(w, b):
        # (co, ci, K) -> (co, K*ci) im2col row order, bias folded as last column.
        co, ci, k = w.shape
        w2 = jnp.transpose(w, (0, 2, 1)).reshape(co, k * ci)
        return jnp.concatenate([w2, b.reshape(co, 1)], axis=1)

    def add_res(p, lc):
        nonlocal c_max
        co, ci, _ = p["w1"].shape
        c_max = max(c_max, ci, co)
        has_skip = "w0" in p
        w1a = conv_aug(p["w1"], p["b1"])                          # (co, K*ci+1)
        if has_skip:
            # The 1x1 skip conv reads exactly the centre-tap rows of the same
            # im2col patches -> stack it under conv1: one MXU pass for both.
            w0e = jnp.zeros((co, K * ci + 1), jnp.float32)
            w0e = w0e.at[:, pad * ci:(pad + 1) * ci].set(p["w0"][:, :, 0])
            w0e = w0e.at[:, -1].set(p["b0"])
            w1a = jnp.concatenate([w1a, w0e], axis=0)             # (2co, K*ci+1)
        i1 = add_mat(w1a)
        i2 = add_mat(conv_aug(p["w2"], p["b2"]))                  # (co, K*co+1)
        plan.append(("res", ci, co, has_skip, i1, i2, lc))

    def add_pool(lc):
        assert lc % 2 == 0, "pooling a non-even length is not supported"
        # TODO(synk): odd-length MaxPool truncation (PyTorch floor) not implemented.
        w = bb * lc
        sel = np.zeros((w - 1, w // 2), np.float32)
        sel[2 * np.arange(w // 2), np.arange(w // 2)] = 1.0       # pick cols 0,2,4,...
        plan.append(("pool", add_mat(sel), lc))

    lc = seq_len
    add_res(params["a"], lc)
    for p in params["conv"]:
        add_res(p, lc)
    for stage in params["conv2"]:
        add_pool(lc)
        lc //= 2
        for p in stage:
            add_res(p, lc)

    nc = params["lin_w"].shape[0]
    wl = jnp.concatenate([params["lin_w"][:, :, 0],
                          params["lin_b"].reshape(nc, 1)], axis=1)  # (nc, h+1)
    plan.append(("linear", nc, add_mat(wl), lc))
    return plan, mats, c_max


def _pack_mats(mats):
    """Pack all matrices into ONE (rows, cmax) buffer; each matrix starts at a
    row offset that is a multiple of 8 (sublane aligned), columns zero-padded."""
    cmax = max(int(m.shape[1]) for m in mats)
    blocks, offs, shapes = [], [], []
    r = 0
    for m in mats:
        rows, cols = int(m.shape[0]), int(m.shape[1])
        rp = -(-rows // 8) * 8
        blocks.append(jnp.zeros((rp, cmax), jnp.float32).at[:rows, :cols].set(m))
        offs.append(r)
        shapes.append((rows, cols))
        r += rp
    return jnp.concatenate(blocks, axis=0), offs, shapes


# ----------------------------------------------------------------------------
# Fused forward kernel (whole network, one batch block per grid step)
# ----------------------------------------------------------------------------
def _make_fused_kernel(plan, offs, shapes, kernel_size, bb):
    K = kernel_size
    pad = K // 2

    def kernel(x_ref, w_ref, o_ref, pad_ref):
        ones_cache = {}

        def ones_row(w):                  # hoisted: JAX does not CSE broadcasts
            if w not in ones_cache:
                ones_cache[w] = jnp.ones((1, w), jnp.float32)
            return ones_cache[w]

        def wmat(idx):                    # static slice of the packed weight buffer
            r0 = offs[idx]
            rows, cols = shapes[idx]
            return w_ref[r0:r0 + rows, 0:cols]

        def write_padded(v, ci, lc):      # per-element zero padding via scratch
            seg = lc + 2 * pad
            for b in range(bb):
                pad_ref[0:ci, b * seg + pad:b * seg + pad + lc] = \
                    v[:, b * lc:(b + 1) * lc]

        def read_patches(ci, lc):         # im2col (K*ci+1, bb*lc), bias row of ones
            seg = lc + 2 * pad
            rows = []
            for k in range(K):
                parts = [pad_ref[0:ci, b * seg + k:b * seg + k + lc]
                         for b in range(bb)]
                rows.append(parts[0] if bb == 1 else jnp.concatenate(parts, axis=1))
            rows.append(ones_row(bb * lc))
            return jnp.concatenate(rows, axis=0)

        pad_ref[...] = jnp.zeros_like(pad_ref)        # pad columns must be zero
        f = x_ref[0].astype(jnp.float32)              # (C_in, bb*L)

        for op in plan:
            if op[0] == "res":
                _, ci, co, has_skip, i1, i2, lc = op
                write_padded(f, ci, lc)
                y = jnp.dot(wmat(i1), read_patches(ci, lc),
                            preferred_element_type=jnp.float32)
                if has_skip:                          # rows co:2co are the 1x1 skip
                    y1, skip = jnp.maximum(y[0:co], 0.0), y[co:2 * co]
                else:
                    y1, skip = jnp.maximum(y, 0.0), f
                write_padded(y1, co, lc)
                y2 = jnp.maximum(
                    jnp.dot(wmat(i2), read_patches(co, lc),
                            preferred_element_type=jnp.float32), 0.0)
                f = y2 + skip                         # fused residual add
            elif op[0] == "pool":
                _, isel, lc = op
                w = bb * lc
                m = jnp.maximum(f[:, 0:w - 1], f[:, 1:w])          # adjacent max
                # even-column selection via packed constant matrix (no iota here)
                f = jnp.dot(m, wmat(isel), preferred_element_type=jnp.float32)
                pad_ref[...] = jnp.zeros_like(pad_ref)  # segment stride changed
            else:                                      # ("linear", nc, idx, lc)
                _, _nc, il, lc = op
                last = jnp.concatenate(
                    [f[:, (b + 1) * lc - 1:(b + 1) * lc] for b in range(bb)],
                    axis=1)                                          # (h, bb)
                last = jnp.concatenate(
                    [last, jnp.ones((1, bb), jnp.float32)], axis=0)  # (h+1, bb)
                logits = jnp.dot(wmat(il), last,
                                 preferred_element_type=jnp.float32)  # (nc, bb)
                o_ref[0] = logits.astype(o_ref.dtype)

    return kernel


# ----------------------------------------------------------------------------
# Forward wrapper: single pallas_call
# ----------------------------------------------------------------------------
def classifier_forward(params, x, kernel_size):
    """x: (B, C_in, L) float32 -> (B, num_class)."""
    assert kernel_size % 2 == 1, "only the default odd-kernel path is implemented"
    # TODO(synk): even kernel_size ('keepdims'), padding=='cyclic', aux>0 and
    #             dropout>0 branches are not implemented.
    B, C_in, L = x.shape
    K = kernel_size
    pad = K // 2
    num_class = params["lin_w"].shape[0]

    # Two programs when possible so both v7x TensorCores get a batch block;
    # on v5e/v6e the extra grid step (~600 cycles) is negligible.
    G = 2 if (B >= 2 and B % 2 == 0) else 1
    BB = B // G

    plan, mats, c_max = _build_plan(params, K, BB, L)
    packed, offs, shapes = _pack_mats(mats)
    kernel = _make_fused_kernel(plan, offs, shapes, K, BB)

    # Batch folded into the lane axis: block g holds original elements g*BB+b.
    x3 = x.reshape(G, BB, C_in, L).transpose(0, 2, 1, 3).reshape(G, C_in, BB * L)

    out = pl.pallas_call(
        kernel,
        out_shape=jax.ShapeDtypeStruct((G, num_class, BB), jnp.float32),
        grid=(G,),
        in_specs=[
            pl.BlockSpec((1, C_in, BB * L), lambda g: (g, 0, 0)),
            pl.BlockSpec(packed.shape, lambda g: (0, 0)),     # ONE packed weight DMA
        ],
        out_specs=pl.BlockSpec((1, num_class, BB), lambda g: (g, 0, 0)),
        scratch_shapes=[pltpu.VMEM((c_max, BB * (L + 2 * pad)), jnp.float32)],
        compiler_params=pltpu.CompilerParams(
            dimension_semantics=("parallel",),
            # Tiny footprint; budgeted against v7x's 64 MiB physical VMEM.
            vmem_limit_bytes=32 * 1024 * 1024,
        ),
    )(x3, packed)
    # (G, nc, BB) -> (B, nc): tiny layout plumbing kept outside the kernel.
    return out.transpose(0, 2, 1).reshape(B, num_class)


# ----------------------------------------------------------------------------
# Pure-JAX (non-Pallas) reference for correctness checking
# ----------------------------------------------------------------------------
def _reference_forward(params, x, kernel_size):
    def conv(x, w, b, padding):
        y = jax.lax.conv_general_dilated(
            x, w, window_strides=(1,), padding=[(padding, padding)],
            dimension_numbers=("NCH", "OIH", "NCH"),
            precision=jax.lax.Precision.HIGHEST)
        return y + b[None, :, None]

    def res_block(x, p, k):
        pad = k // 2
        y = jnp.maximum(conv(x, p["w1"], p["b1"], pad), 0.0)
        y = jnp.maximum(conv(y, p["w2"], p["b2"], pad), 0.0)
        skip = conv(x, p["w0"], p["b0"], 0) if "w0" in p else x
        return y + skip

    f = res_block(x, params["a"], kernel_size)
    for p in params["conv"]:
        f = res_block(f, p, kernel_size)
    for stage in params["conv2"]:
        B, C, L = f.shape
        f = jnp.max(f[:, :, :(L // 2) * 2].reshape(B, C, L // 2, 2), axis=-1)
        for p in stage:
            f = res_block(f, p, kernel_size)
    y = conv(f, params["lin_w"], params["lin_b"], 0)
    return y[:, :, -1]


# ----------------------------------------------------------------------------
# Deterministic parameter init (shapes follow Classifier.__init__)
# ----------------------------------------------------------------------------
def _conv_params(key, c_out, c_in, k):
    kw, kb = jax.random.split(key)
    scale = 1.0 / jnp.sqrt(jnp.float32(c_in * k))
    w = jax.random.uniform(kw, (c_out, c_in, k), jnp.float32, -scale, scale)
    b = jax.random.uniform(kb, (c_out,), jnp.float32, -scale, scale)
    return w, b


def _res_block_params(key, c_in, c_out, k):
    k1, k2, k0 = jax.random.split(key, 3)
    p = {}
    p["w1"], p["b1"] = _conv_params(k1, c_out, c_in, k)
    p["w2"], p["b2"] = _conv_params(k2, c_out, c_out, k)
    if c_in != c_out:
        p["w0"], p["b0"] = _conv_params(k0, c_out, c_in, 1)
    return p


def init_classifier(key, num_inputs, num_class, depth, nlayer, kernel_size,
                    hidden_conv, max_hidden):
    keys = iter(jax.random.split(key, 128))
    params = {}
    params["a"] = _res_block_params(next(keys), num_inputs, hidden_conv, kernel_size)
    params["conv"] = [
        _res_block_params(next(keys), hidden_conv, hidden_conv, kernel_size)
        for _ in range(nlayer - 1)
    ]
    params["conv2"] = []
    h = hidden_conv
    for i in range(depth - 1):
        h0 = min(max_hidden, hidden_conv * 2 ** i)
        h = min(max_hidden, hidden_conv * 2 ** (i + 1))
        stage = [_res_block_params(next(keys), h0, h, kernel_size)]
        for _ in range(nlayer - 1):
            stage.append(_res_block_params(next(keys), h, h, kernel_size))
        params["conv2"].append(stage)
    # aux == 0 path: self.linear = nn.Conv1d(h, num_class, 1)
    params["lin_w"], params["lin_b"] = _conv_params(next(keys), num_class, h, 1)
    return params


# ----------------------------------------------------------------------------
if __name__ == "__main__":
    key = jax.random.PRNGKey(0)
    k_param, k_x = jax.random.split(key)

    # Small config consistent with the module defaults (scaled down).
    B, num_inputs, L = 2, 4, 16
    num_class = 5
    depth, nlayer, kernel_size = 3, 2, 3
    hidden_conv, max_hidden = 8, 16

    params = init_classifier(k_param, num_inputs, num_class, depth, nlayer,
                             kernel_size, hidden_conv, max_hidden)
    x = jax.random.normal(k_x, (B, num_inputs, L), dtype=jnp.float32)

    fwd = jax.jit(functools.partial(classifier_forward, kernel_size=kernel_size))
    out = jax.block_until_ready(fwd(params, x))
    assert out.shape == (B, num_class), out.shape
    assert bool(jnp.all(jnp.isfinite(out)))

    ref = jax.block_until_ready(_reference_forward(params, x, kernel_size))
    assert bool(jnp.allclose(out, ref, rtol=2e-2, atol=2e-2)), (out, ref)

    print("KERNEL_OK")
</pallas_src>

<mosaic_0001>
module attributes {stable_mosaic.version = 11 : i64} {
  func.func @kernel(%arg0: i32, %arg1: memref<1x4x16xf32, #tpu.memory_space<vmem>>, %arg2: memref<216x49xf32, #tpu.memory_space<vmem>>, %arg3: memref<1x5x1xf32, #tpu.memory_space<vmem>>, %arg4: memref<16x18xf32, #tpu.memory_space<vmem>>) attributes {dimension_semantics = [#tpu.dimension_semantics<parallel>], iteration_bounds = array<i64: 2>, scalar_prefetch = 0 : i64, scratch_operands = 1 : i64, tpu.core_type = #tpu.core_type<tc>, window_params = [{transform_indices = @transform_0, window_bounds = array<i64: 1, 4, 16>}, {pipeline_mode = #tpu.pipeline_mode<synchronous>, transform_indices = @transform_1, window_bounds = array<i64: 216, 49>}, {transform_indices = @transform_2, window_bounds = array<i64: 1, 5, 1>}]} {
    %cst = arith.constant 0.000000e+00 : f32
    %0 = vector.broadcast %cst : f32 to vector<16x18xf32>
    %c0 = arith.constant 0 : index
    %c0_0 = arith.constant 0 : index
    %1 = vector.load %arg4[%c0, %c0_0] : memref<16x18xf32, #tpu.memory_space<vmem>>, vector<16x18xf32>
    tpu.vector_store %arg4[%c0, %c0_0], %0 {strides = array<i32>} : memref<16x18xf32, #tpu.memory_space<vmem>>, vector<16x18xf32>,
    %c0_1 = arith.constant 0 : index
    %c0_2 = arith.constant 0 : index
    %c0_3 = arith.constant 0 : index
    %2 = vector.load %arg1[%c0_1, %c0_2, %c0_3] : memref<1x4x16xf32, #tpu.memory_space<vmem>>, vector<1x4x16xf32>
    %3 = vector.shape_cast %2 : vector<1x4x16xf32> to vector<4x16xf32>
    %c0_4 = arith.constant 0 : index
    %c1 = arith.constant 1 : index
    %4 = vector.load %arg4[%c0_4, %c1] : memref<16x18xf32, #tpu.memory_space<vmem>>, vector<4x16xf32>
    tpu.vector_store %arg4[%c0_4, %c1], %3 {strides = array<i32>} : memref<16x18xf32, #tpu.memory_space<vmem>>, vector<4x16xf32>,
    %c0_5 = arith.constant 0 : index
    %c0_6 = arith.constant 0 : index
    %5 = vector.load %arg2[%c0_5, %c0_6] : memref<216x49xf32, #tpu.memory_space<vmem>>, vector<16x13xf32>
    %c0_7 = arith.constant 0 : index
    %c0_8 = arith.constant 0 : index
    %6 = vector.load %arg4[%c0_7, %c0_8] : memref<16x18xf32, #tpu.memory_space<vmem>>, vector<4x16xf32>
    %c0_9 = arith.constant 0 : index
    %c1_10 = arith.constant 1 : index
    %7 = vector.load %arg4[%c0_9, %c1_10] : memref<16x18xf32, #tpu.memory_space<vmem>>, vector<4x16xf32>
    %c0_11 = arith.constant 0 : index
    %c2 = arith.constant 2 : index
    %8 = vector.load %arg4[%c0_11, %c2] : memref<16x18xf32, #tpu.memory_space<vmem>>, vector<4x16xf32>
    %cst_12 = arith.constant 1.000000e+00 : f32
    %9 = vector.broadcast %cst_12 : f32 to vector<1x16xf32>
    %10 = tpu.concatenate %6, %7, %8, %9 in 0 : vector<4x16xf32>, vector<4x16xf32>, vector<4x16xf32>, vector<1x16xf32> -> vector<13x16xf32>
    %cst_13 = arith.constant dense<0.000000e+00> : vector<16x16xf32>
    %11 = tpu.matmul %5, %10, %cst_13 {dimension_numbers = #tpu.dot_dimension_numbers<[1], [0], [0], [1], [0, 0, 1, 1], [], []>} : vector<16x13xf32>, vector<13x16xf32>, vector<16x16xf32> -> vector<16x16xf32>
    %12 = vector.extract_strided_slice %11 {offsets = [0, 0], sizes = [8, 16], strides = [1, 1]} : vector<16x16xf32> to vector<8x16xf32>
    %cst_14 = arith.constant 0.000000e+00 : f32
    %13 = vector.broadcast %cst_14 : f32 to vector<8x16xf32>
    %14 = arith.maximumf %12, %13 : vector<8x16xf32>
    %15 = vector.extract_strided_slice %11 {offsets = [8, 0], sizes = [8, 16], strides = [1, 1]} : vector<16x16xf32> to vector<8x16xf32>
    %c0_15 = arith.constant 0 : index
    %c1_16 = arith.constant 1 : index
    %16 = vector.load %arg4[%c0_15, %c1_16] : memref<16x18xf32, #tpu.memory_space<vmem>>, vector<8x16xf32>
    tpu.vector_store %arg4[%c0_15, %c1_16], %14 {strides = array<i32>} : memref<16x18xf32, #tpu.memory_space<vmem>>, vector<8x16xf32>,
    %c16 = arith.constant 16 : index
    %c0_17 = arith.constant 0 : index
    %17 = vector.load %arg2[%c16, %c0_17] : memref<216x49xf32, #tpu.memory_space<vmem>>, vector<8x25xf32>
    %c0_18 = arith.constant 0 : index
    %c0_19 = arith.constant 0 : index
    %18 = vector.load %arg4[%c0_18, %c0_19] : memref<16x18xf32, #tpu.memory_space<vmem>>, vector<8x16xf32>
    %c0_20 = arith.constant 0 : index
    %c1_21 = arith.constant 1 : index
    %19 = vector.load %arg4[%c0_20, %c1_21] : memref<16x18xf32, #tpu.memory_space<vmem>>, vector<8x16xf32>
    %c0_22 = arith.constant 0 : index
    %c2_23 = arith.constant 2 : index
    %20 = vector.load %arg4[%c0_22, %c2_23] : memref<16x18xf32, #tpu.memory_space<vmem>>, vector<8x16xf32>
    %21 = tpu.concatenate %18, %19, %20, %9 in 0 : vector<8x16xf32>, vector<8x16xf32>, vector<8x16xf32>, vector<1x16xf32> -> vector<25x16xf32>
    %cst_24 = arith.constant dense<0.000000e+00> : vector<8x16xf32>
    %22 = tpu.matmul %17, %21, %cst_24 {dimension_numbers = #tpu.dot_dimension_numbers<[1], [0], [0], [1], [0, 0, 1, 1], [], []>} : vector<8x25xf32>, vector<25x16xf32>, vector<8x16xf32> -> vector<8x16xf32>
    %cst_25 = arith.constant 0.000000e+00 : f32
    %23 = vector.broadcast %cst_25 : f32 to vector<8x16xf32>
    %24 = arith.maximumf %22, %23 : vector<8x16xf32>
    %25 = arith.addf %24, %15 : vector<8x16xf32>
    %c0_26 = arith.constant 0 : index
    %c1_27 = arith.constant 1 : index
    %26 = vector.load %arg4[%c0_26, %c1_27] : memref<16x18xf32, #tpu.memory_space<vmem>>, vector<8x16xf32>
    tpu.vector_store %arg4[%c0_26, %c1_27], %25 {strides = array<i32>} : memref<16x18xf32, #tpu.memory_space<vmem>>, vector<8x16xf32>,
    %c24 = arith.constant 24 : index
    %c0_28 = arith.constant 0 : index
    %27 = vector.load %arg2[%c24, %c0_28] : memref<216x49xf32, #tpu.memory_space<vmem>>, vector<8x25xf32>
    %c0_29 = arith.constant 0 : index
    %c0_30 = arith.constant 0 : index
    %28 = vector.load %arg4[%c0_29, %c0_30] : memref<16x18xf32, #tpu.memory_space<vmem>>, vector<8x16xf32>
    %c0_31 = arith.constant 0 : index
    %c1_32 = arith.constant 1 : index
    %29 = vector.load %arg4[%c0_31, %c1_32] : memref<16x18xf32, #tpu.memory_space<vmem>>, vector<8x16xf32>
    %c0_33 = arith.constant 0 : index
    %c2_34 = arith.constant 2 : index
    %30 = vector.load %arg4[%c0_33, %c2_34] : memref<16x18xf32, #tpu.memory_space<vmem>>, vector<8x16xf32>
    %31 = tpu.concatenate %28, %29, %30, %9 in 0 : vector<8x16xf32>, vector<8x16xf32>, vector<8x16xf32>, vector<1x16xf32> -> vector<25x16xf32>
    %cst_35 = arith.constant dense<0.000000e+00> : vector<8x16xf32>
    %32 = tpu.matmul %27, %31, %cst_35 {dimension_numbers = #tpu.dot_dimension_numbers<[1], [0], [0], [1], [0, 0, 1, 1], [], []>} : vector<8x25xf32>, vector<25x16xf32>, vector<8x16xf32> -> vector<8x16xf32>
    %cst_36 = arith.constant 0.000000e+00 : f32
    %33 = vector.broadcast %cst_36 : f32 to vector<8x16xf32>
    %34 = arith.maximumf %32, %33 : vector<8x16xf32>
    %c0_37 = arith.constant 0 : index
    %c1_38 = arith.constant 1 : index
    %35 = vector.load %arg4[%c0_37, %c1_38] : memref<16x18xf32, #tpu.memory_space<vmem>>, vector<8x16xf32>
    tpu.vector_store %arg4[%c0_37, %c1_38], %34 {strides = array<i32>} : memref<16x18xf32, #tpu.memory_space<vmem>>, vector<8x16xf32>,
    %c32 = arith.constant 32 : index
    %c0_39 = arith.constant 0 : index
    %36 = vector.load %arg2[%c32, %c0_39] : memref<216x49xf32, #tpu.memory_space<vmem>>, vector<8x25xf32>
    %c0_40 = arith.constant 0 : index
    %c0_41 = arith.constant 0 : index
    %37 = vector.load %arg4[%c0_40, %c0_41] : memref<16x18xf32, #tpu.memory_space<vmem>>, vector<8x16xf32>
    %c0_42 = arith.constant 0 : index
    %c1_43 = arith.constant 1 : index
    %38 = vector.load %arg4[%c0_42, %c1_43] : memref<16x18xf32, #tpu.memory_space<vmem>>, vector<8x16xf32>
    %c0_44 = arith.constant 0 : index
    %c2_45 = arith.constant 2 : index
    %39 = vector.load %arg4[%c0_44, %c2_45] : memref<16x18xf32, #tpu.memory_space<vmem>>, vector<8x16xf32>
    %40 = tpu.concatenate %37, %38, %39, %9 in 0 : vector<8x16xf32>, vector<8x16xf32>, vector<8x16xf32>, vector<1x16xf32> -> vector<25x16xf32>
    %cst_46 = arith.constant dense<0.000000e+00> : vector<8x16xf32>
    %41 = tpu.matmul %36, %40, %cst_46 {dimension_numbers = #tpu.dot_dimension_numbers<[1], [0], [0], [1], [0, 0, 1, 1], [], []>} : vector<8x25xf32>, vector<25x16xf32>, vector<8x16xf32> -> vector<8x16xf32>
    %cst_47 = arith.constant 0.000000e+00 : f32
    %42 = vector.broadcast %cst_47 : f32 to vector<8x16xf32>
    %43 = arith.maximumf %41, %42 : vector<8x16xf32>
    %44 = arith.addf %43, %25 : vector<8x16xf32>
    %45 = vector.extract_strided_slice %44 {offsets = [0, 0], sizes = [8, 15], strides = [1, 1]} : vector<8x16xf32> to vector<8x15xf32>
    %46 = vector.extract_strided_slice %44 {offsets = [0, 1], sizes = [8, 15], strides = [1, 1]} : vector<8x16xf32> to vector<8x15xf32>
    %47 = arith.maximumf %45, %46 : vector<8x15xf32>
    %c40 = arith.constant 40 : index
    %c0_48 = arith.constant 0 : index
    %48 = vector.load %arg2[%c40, %c0_48] : memref<216x49xf32, #tpu.memory_space<vmem>>, vector<15x8xf32>
    %cst_49 = arith.constant dense<0.000000e+00> : vector<8x8xf32>
    %49 = tpu.matmul %47, %48, %cst_49 {dimension_numbers = #tpu.dot_dimension_numbers<[1], [0], [0], [1], [0, 0, 1, 1], [], []>} : vector<8x15xf32>, vector<15x8xf32>, vector<8x8xf32> -> vector<8x8xf32>
    %cst_50 = arith.constant 0.000000e+00 : f32
    %50 = vector.broadcast %cst_50 : f32 to vector<16x18xf32>
    %c0_51 = arith.constant 0 : index
    %c0_52 = arith.constant 0 : index
    %51 = vector.load %arg4[%c0_51, %c0_52] : memref<16x18xf32, #tpu.memory_space<vmem>>, vector<16x18xf32>
    tpu.vector_store %arg4[%c0_51, %c0_52], %50 {strides = array<i32>} : memref<16x18xf32, #tpu.memory_space<vmem>>, vector<16x18xf32>,
    %c0_53 = arith.constant 0 : index
    %c1_54 = arith.constant 1 : index
    %52 = vector.load %arg4[%c0_53, %c1_54] : memref<16x18xf32, #tpu.memory_space<vmem>>, vector<8x8xf32>
    tpu.vector_store %arg4[%c0_53, %c1_54], %49 {strides = array<i32>} : memref<16x18xf32, #tpu.memory_space<vmem>>, vector<8x8xf32>,
    %c56 = arith.constant 56 : index
    %c0_55 = arith.constant 0 : index
    %53 = vector.load %arg2[%c56, %c0_55] : memref<216x49xf32, #tpu.memory_space<vmem>>, vector<32x25xf32>
    %c0_56 = arith.constant 0 : index
    %c0_57 = arith.constant 0 : index
    %54 = vector.load %arg4[%c0_56, %c0_57] : memref<16x18xf32, #tpu.memory_space<vmem>>, vector<8x8xf32>
    %c0_58 = arith.constant 0 : index
    %c1_59 = arith.constant 1 : index
    %55 = vector.load %arg4[%c0_58, %c1_59] : memref<16x18xf32, #tpu.memory_space<vmem>>, vector<8x8xf32>
    %c0_60 = arith.constant 0 : index
    %c2_61 = arith.constant 2 : index
    %56 = vector.load %arg4[%c0_60, %c2_61] : memref<16x18xf32, #tpu.memory_space<vmem>>, vector<8x8xf32>
    %cst_62 = arith.constant 1.000000e+00 : f32
    %57 = vector.broadcast %cst_62 : f32 to vector<1x8xf32>
    %58 = tpu.concatenate %54, %55, %56, %57 in 0 : vector<8x8xf32>, vector<8x8xf32>, vector<8x8xf32>, vector<1x8xf32> -> vector<25x8xf32>
    %cst_63 = arith.constant dense<0.000000e+00> : vector<32x8xf32>
    %59 = tpu.matmul %53, %58, %cst_63 {dimension_numbers = #tpu.dot_dimension_numbers<[1], [0], [0], [1], [0, 0, 1, 1], [], []>} : vector<32x25xf32>, vector<25x8xf32>, vector<32x8xf32> -> vector<32x8xf32>
    %60 = vector.extract_strided_slice %59 {offsets = [0, 0], sizes = [16, 8], strides = [1, 1]} : vector<32x8xf32> to vector<16x8xf32>
    %cst_64 = arith.constant 0.000000e+00 : f32
    %61 = vector.broadcast %cst_64 : f32 to vector<16x8xf32>
    %62 = arith.maximumf %60, %61 : vector<16x8xf32>
    %63 = vector.extract_strided_slice %59 {offsets = [16, 0], sizes = [16, 8], strides = [1, 1]} : vector<32x8xf32> to vector<16x8xf32>
    %c0_65 = arith.constant 0 : index
    %c1_66 = arith.constant 1 : index
    %64 = vector.load %arg4[%c0_65, %c1_66] : memref<16x18xf32, #tpu.memory_space<vmem>>, vector<16x8xf32>
    tpu.vector_store %arg4[%c0_65, %c1_66], %62 {strides = array<i32>} : memref<16x18xf32, #tpu.memory_space<vmem>>, vector<16x8xf32>,
    %c88 = arith.constant 88 : index
    %c0_67 = arith.constant 0 : index
    %65 = vector.load %arg2[%c88, %c0_67] : memref<216x49xf32, #tpu.memory_space<vmem>>, vector<16x49xf32>
    %c0_68 = arith.constant 0 : index
    %c0_69 = arith.constant 0 : index
    %66 = vector.load %arg4[%c0_68, %c0_69] : memref<16x18xf32, #tpu.memory_space<vmem>>, vector<16x8xf32>
    %c0_70 = arith.constant 0 : index
    %c1_71 = arith.constant 1 : index
    %67 = vector.load %arg4[%c0_70, %c1_71] : memref<16x18xf32, #tpu.memory_space<vmem>>, vector<16x8xf32>
    %c0_72 = arith.constant 0 : index
    %c2_73 = arith.constant 2 : index
    %68 = vector.load %arg4[%c0_72, %c2_73] : memref<16x18xf32, #tpu.memory_space<vmem>>, vector<16x8xf32>
    %69 = tpu.concatenate %66, %67, %68, %57 in 0 : vector<16x8xf32>, vector<16x8xf32>, vector<16x8xf32>, vector<1x8xf32> -> vector<49x8xf32>
    %cst_74 = arith.constant dense<0.000000e+00> : vector<16x8xf32>
    %70 = tpu.matmul %65, %69, %cst_74 {dimension_numbers = #tpu.dot_dimension_numbers<[1], [0], [0], [1], [0, 0, 1, 1], [], []>} : vector<16x49xf32>, vector<49x8xf32>, vector<16x8xf32> -> vector<16x8xf32>
    %cst_75 = arith.constant 0.000000e+00 : f32
    %71 = vector.broadcast %cst_75 : f32 to vector<16x8xf32>
    %72 = arith.maximumf %70, %71 : vector<16x8xf32>
    %73 = arith.addf %72, %63 : vector<16x8xf32>
    %c0_76 = arith.constant 0 : index
    %c1_77 = arith.constant 1 : index
    %74 = vector.load %arg4[%c0_76, %c1_77] : memref<16x18xf32, #tpu.memory_space<vmem>>, vector<16x8xf32>
    tpu.vector_store %arg4[%c0_76, %c1_77], %73 {strides = array<i32>} : memref<16x18xf32, #tpu.memory_space<vmem>>, vector<16x8xf32>,
    %c104 = arith.constant 104 : index
    %c0_78 = arith.constant 0 : index
    %75 = vector.load %arg2[%c104, %c0_78] : memref<216x49xf32, #tpu.memory_space<vmem>>, vector<16x49xf32>
    %c0_79 = arith.constant 0 : index
    %c0_80 = arith.constant 0 : index
    %76 = vector.load %arg4[%c0_79, %c0_80] : memref<16x18xf32, #tpu.memory_space<vmem>>, vector<16x8xf32>
    %c0_81 = arith.constant 0 : index
    %c1_82 = arith.constant 1 : index
    %77 = vector.load %arg4[%c0_81, %c1_82] : memref<16x18xf32, #tpu.memory_space<vmem>>, vector<16x8xf32>
    %c0_83 = arith.constant 0 : index
    %c2_84 = arith.constant 2 : index
    %78 = vector.load %arg4[%c0_83, %c2_84] : memref<16x18xf32, #tpu.memory_space<vmem>>, vector<16x8xf32>
    %79 = tpu.concatenate %76, %77, %78, %57 in 0 : vector<16x8xf32>, vector<16x8xf32>, vector<16x8xf32>, vector<1x8xf32> -> vector<49x8xf32>
    %cst_85 = arith.constant dense<0.000000e+00> : vector<16x8xf32>
    %80 = tpu.matmul %75, %79, %cst_85 {dimension_numbers = #tpu.dot_dimension_numbers<[1], [0], [0], [1], [0, 0, 1, 1], [], []>} : vector<16x49xf32>, vector<49x8xf32>, vector<16x8xf32> -> vector<16x8xf32>
    %cst_86 = arith.constant 0.000000e+00 : f32
    %81 = vector.broadcast %cst_86 : f32 to vector<16x8xf32>
    %82 = arith.maximumf %80, %81 : vector<16x8xf32>
    %c0_87 = arith.constant 0 : index
    %c1_88 = arith.constant 1 : index
    %83 = vector.load %arg4[%c0_87, %c1_88] : memref<16x18xf32, #tpu.memory_space<vmem>>, vector<16x8xf32>
    tpu.vector_store %arg4[%c0_87, %c1_88], %82 {strides = array<i32>} : memref<16x18xf32, #tpu.memory_space<vmem>>, vector<16x8xf32>,
    %c120 = arith.constant 120 : index
    %c0_89 = arith.constant 0 : index
    %84 = vector.load %arg2[%c120, %c0_89] : memref<216x49xf32, #tpu.memory_space<vmem>>, vector<16x49xf32>
    %c0_90 = arith.constant 0 : index
    %c0_91 = arith.constant 0 : index
    %85 = vector.load %arg4[%c0_90, %c0_91] : memref<16x18xf32, #tpu.memory_space<vmem>>, vector<16x8xf32>
    %c0_92 = arith.constant 0 : index
    %c1_93 = arith.constant 1 : index
    %86 = vector.load %arg4[%c0_92, %c1_93] : memref<16x18xf32, #tpu.memory_space<vmem>>, vector<16x8xf32>
    %c0_94 = arith.constant 0 : index
    %c2_95 = arith.constant 2 : index
    %87 = vector.load %arg4[%c0_94, %c2_95] : memref<16x18xf32, #tpu.memory_space<vmem>>, vector<16x8xf32>
    %88 = tpu.concatenate %85, %86, %87, %57 in 0 : vector<16x8xf32>, vector<16x8xf32>, vector<16x8xf32>, vector<1x8xf32> -> vector<49x8xf32>
    %cst_96 = arith.constant dense<0.000000e+00> : vector<16x8xf32>
    %89 = tpu.matmul %84, %88, %cst_96 {dimension_numbers = #tpu.dot_dimension_numbers<[1], [0], [0], [1], [0, 0, 1, 1], [], []>} : vector<16x49xf32>, vector<49x8xf32>, vector<16x8xf32> -> vector<16x8xf32>
    %cst_97 = arith.constant 0.000000e+00 : f32
    %90 = vector.broadcast %cst_97 : f32 to vector<16x8xf32>
    %91 = arith.maximumf %89, %90 : vector<16x8xf32>
    %92 = arith.addf %91, %73 : vector<16x8xf32>
    %93 = vector.extract_strided_slice %92 {offsets = [0, 0], sizes = [16, 7], strides = [1, 1]} : vector<16x8xf32> to vector<16x7xf32>
    %94 = vector.extract_strided_slice %92 {offsets = [0, 1], sizes = [16, 7], strides = [1, 1]} : vector<16x8xf32> to vector<16x7xf32>
    %95 = arith.maximumf %93, %94 : vector<16x7xf32>
    %c136 = arith.constant 136 : index
    %c0_98 = arith.constant 0 : index
    %96 = vector.load %arg2[%c136, %c0_98] : memref<216x49xf32, #tpu.memory_space<vmem>>, vector<7x4xf32>
    %cst_99 = arith.constant dense<0.000000e+00> : vector<16x4xf32>
    %97 = tpu.matmul %95, %96, %cst_99 {dimension_numbers = #tpu.dot_dimension_numbers<[1], [0], [0], [1], [0, 0, 1, 1], [], []>} : vector<16x7xf32>, vector<7x4xf32>, vector<16x4xf32> -> vector<16x4xf32>
    %cst_100 = arith.constant 0.000000e+00 : f32
    %98 = vector.broadcast %cst_100 : f32 to vector<16x18xf32>
    %c0_101 = arith.constant 0 : index
    %c0_102 = arith.constant 0 : index
    %99 = vector.load %arg4[%c0_101, %c0_102] : memref<16x18xf32, #tpu.memory_space<vmem>>, vector<16x18xf32>
    tpu.vector_store %arg4[%c0_101, %c0_102], %98 {strides = array<i32>} : memref<16x18xf32, #tpu.memory_space<vmem>>, vector<16x18xf32>,
    %c0_103 = arith.constant 0 : index
    %c1_104 = arith.constant 1 : index
    %100 = vector.load %arg4[%c0_103, %c1_104] : memref<16x18xf32, #tpu.memory_space<vmem>>, vector<16x4xf32>
    tpu.vector_store %arg4[%c0_103, %c1_104], %97 {strides = array<i32>} : memref<16x18xf32, #tpu.memory_space<vmem>>, vector<16x4xf32>,
    %c144 = arith.constant 144 : index
    %c0_105 = arith.constant 0 : index
    %101 = vector.load %arg2[%c144, %c0_105] : memref<216x49xf32, #tpu.memory_space<vmem>>, vector<16x49xf32>
    %c0_106 = arith.constant 0 : index
    %c0_107 = arith.constant 0 : index
    %102 = vector.load %arg4[%c0_106, %c0_107] : memref<16x18xf32, #tpu.memory_space<vmem>>, vector<16x4xf32>
    %c0_108 = arith.constant 0 : index
    %c1_109 = arith.constant 1 : index
    %103 = vector.load %arg4[%c0_108, %c1_109] : memref<16x18xf32, #tpu.memory_space<vmem>>, vector<16x4xf32>
    %c0_110 = arith.constant 0 : index
    %c2_111 = arith.constant 2 : index
    %104 = vector.load %arg4[%c0_110, %c2_111] : memref<16x18xf32, #tpu.memory_space<vmem>>, vector<16x4xf32>
    %cst_112 = arith.constant 1.000000e+00 : f32
    %105 = vector.broadcast %cst_112 : f32 to vector<1x4xf32>
    %106 = tpu.concatenate %102, %103, %104, %105 in 0 : vector<16x4xf32>, vector<16x4xf32>, vector<16x4xf32>, vector<1x4xf32> -> vector<49x4xf32>
    %cst_113 = arith.constant dense<0.000000e+00> : vector<16x4xf32>
    %107 = tpu.matmul %101, %106, %cst_113 {dimension_numbers = #tpu.dot_dimension_numbers<[1], [0], [0], [1], [0, 0, 1, 1], [], []>} : vector<16x49xf32>, vector<49x4xf32>, vector<16x4xf32> -> vector<16x4xf32>
    %cst_114 = arith.constant 0.000000e+00 : f32
    %108 = vector.broadcast %cst_114 : f32 to vector<16x4xf32>
    %109 = arith.maximumf %107, %108 : vector<16x4xf32>
    %c0_115 = arith.constant 0 : index
    %c1_116 = arith.constant 1 : index
    %110 = vector.load %arg4[%c0_115, %c1_116] : memref<16x18xf32, #tpu.memory_space<vmem>>, vector<16x4xf32>
    tpu.vector_store %arg4[%c0_115, %c1_116], %109 {strides = array<i32>} : memref<16x18xf32, #tpu.memory_space<vmem>>, vector<16x4xf32>,
    %c160 = arith.constant 160 : index
    %c0_117 = arith.constant 0 : index
    %111 = vector.load %arg2[%c160, %c0_117] : memref<216x49xf32, #tpu.memory_space<vmem>>, vector<16x49xf32>
    %c0_118 = arith.constant 0 : index
    %c0_119 = arith.constant 0 : index
    %112 = vector.load %arg4[%c0_118, %c0_119] : memref<16x18xf32, #tpu.memory_space<vmem>>, vector<16x4xf32>
    %c0_120 = arith.constant 0 : index
    %c1_121 = arith.constant 1 : index
    %113 = vector.load %arg4[%c0_120, %c1_121] : memref<16x18xf32, #tpu.memory_space<vmem>>, vector<16x4xf32>
    %c0_122 = arith.constant 0 : index
    %c2_123 = arith.constant 2 : index
    %114 = vector.load %arg4[%c0_122, %c2_123] : memref<16x18xf32, #tpu.memory_space<vmem>>, vector<16x4xf32>
    %115 = tpu.concatenate %112, %113, %114, %105 in 0 : vector<16x4xf32>, vector<16x4xf32>, vector<16x4xf32>, vector<1x4xf32> -> vector<49x4xf32>
    %cst_124 = arith.constant dense<0.000000e+00> : vector<16x4xf32>
    %116 = tpu.matmul %111, %115, %cst_124 {dimension_numbers = #tpu.dot_dimension_numbers<[1], [0], [0], [1], [0, 0, 1, 1], [], []>} : vector<16x49xf32>, vector<49x4xf32>, vector<16x4xf32> -> vector<16x4xf32>
    %cst_125 = arith.constant 0.000000e+00 : f32
    %117 = vector.broadcast %cst_125 : f32 to vector<16x4xf32>
    %118 = arith.maximumf %116, %117 : vector<16x4xf32>
    %119 = arith.addf %118, %97 : vector<16x4xf32>
    %c0_126 = arith.constant 0 : index
    %c1_127 = arith.constant 1 : index
    %120 = vector.load %arg4[%c0_126, %c1_127] : memref<16x18xf32, #tpu.memory_space<vmem>>, vector<16x4xf32>
    tpu.vector_store %arg4[%c0_126, %c1_127], %119 {strides = array<i32>} : memref<16x18xf32, #tpu.memory_space<vmem>>, vector<16x4xf32>,
    %c176 = arith.constant 176 : index
    %c0_128 = arith.constant 0 : index
    %121 = vector.load %arg2[%c176, %c0_128] : memref<216x49xf32, #tpu.memory_space<vmem>>, vector<16x49xf32>
    %c0_129 = arith.constant 0 : index
    %c0_130 = arith.constant 0 : index
    %122 = vector.load %arg4[%c0_129, %c0_130] : memref<16x18xf32, #tpu.memory_space<vmem>>, vector<16x4xf32>
    %c0_131 = arith.constant 0 : index
    %c1_132 = arith.constant 1 : index
    %123 = vector.load %arg4[%c0_131, %c1_132] : memref<16x18xf32, #tpu.memory_space<vmem>>, vector<16x4xf32>
    %c0_133 = arith.constant 0 : index
    %c2_134 = arith.constant 2 : index
    %124 = vector.load %arg4[%c0_133, %c2_134] : memref<16x18xf32, #tpu.memory_space<vmem>>, vector<16x4xf32>
    %125 = tpu.concatenate %122, %123, %124, %105 in 0 : vector<16x4xf32>, vector<16x4xf32>, vector<16x4xf32>, vector<1x4xf32> -> vector<49x4xf32>
    %cst_135 = arith.constant dense<0.000000e+00> : vector<16x4xf32>
    %126 = tpu.matmul %121, %125, %cst_135 {dimension_numbers = #tpu.dot_dimension_numbers<[1], [0], [0], [1], [0, 0, 1, 1], [], []>} : vector<16x49xf32>, vector<49x4xf32>, vector<16x4xf32> -> vector<16x4xf32>
    %cst_136 = arith.constant 0.000000e+00 : f32
    %127 = vector.broadcast %cst_136 : f32 to vector<16x4xf32>
    %128 = arith.maximumf %126, %127 : vector<16x4xf32>
    %c0_137 = arith.constant 0 : index
    %c1_138 = arith.constant 1 : index
    %129 = vector.load %arg4[%c0_137, %c1_138] : memref<16x18xf32, #tpu.memory_space<vmem>>, vector<16x4xf32>
    tpu.vector_store %arg4[%c0_137, %c1_138], %128 {strides = array<i32>} : memref<16x18xf32, #tpu.memory_space<vmem>>, vector<16x4xf32>,
    %c192 = arith.constant 192 : index
    %c0_139 = arith.constant 0 : index
    %130 = vector.load %arg2[%c192, %c0_139] : memref<216x49xf32, #tpu.memory_space<vmem>>, vector<16x49xf32>
    %c0_140 = arith.constant 0 : index
    %c0_141 = arith.constant 0 : index
    %131 = vector.load %arg4[%c0_140, %c0_141] : memref<16x18xf32, #tpu.memory_space<vmem>>, vector<16x4xf32>
    %c0_142 = arith.constant 0 : index
    %c1_143 = arith.constant 1 : index
    %132 = vector.load %arg4[%c0_142, %c1_143] : memref<16x18xf32, #tpu.memory_space<vmem>>, vector<16x4xf32>
    %c0_144 = arith.constant 0 : index
    %c2_145 = arith.constant 2 : index
    %133 = vector.load %arg4[%c0_144, %c2_145] : memref<16x18xf32, #tpu.memory_space<vmem>>, vector<16x4xf32>
    %134 = tpu.concatenate %131, %132, %133, %105 in 0 : vector<16x4xf32>, vector<16x4xf32>, vector<16x4xf32>, vector<1x4xf32> -> vector<49x4xf32>
    %cst_146 = arith.constant dense<0.000000e+00> : vector<16x4xf32>
    %135 = tpu.matmul %130, %134, %cst_146 {dimension_numbers = #tpu.dot_dimension_numbers<[1], [0], [0], [1], [0, 0, 1, 1], [], []>} : vector<16x49xf32>, vector<49x4xf32>, vector<16x4xf32> -> vector<16x4xf32>
    %cst_147 = arith.constant 0.000000e+00 : f32
    %136 = vector.broadcast %cst_147 : f32 to vector<16x4xf32>
    %137 = arith.maximumf %135, %136 : vector<16x4xf32>
    %138 = arith.addf %137, %119 : vector<16x4xf32>
    %139 = vector.extract_strided_slice %138 {offsets = [0, 3], sizes = [16, 1], strides = [1, 1]} : vector<16x4xf32> to vector<16x1xf32>
    %cst_148 = arith.constant 1.000000e+00 : f32
    %140 = vector.broadcast %cst_148 : f32 to vector<1x1xf32>
    %141 = tpu.concatenate %139, %140 in 0 : vector<16x1xf32>, vector<1x1xf32> -> vector<17x1xf32>
    %c208 = arith.constant 208 : index
    %c0_149 = arith.constant 0 : index
    %142 = vector.load %arg2[%c208, %c0_149] : memref<216x49xf32, #tpu.memory_space<vmem>>, vector<5x17xf32>
    %cst_150 = arith.constant dense<0.000000e+00> : vector<5x1xf32>
    %143 = tpu.matmul %142, %141, %cst_150 {dimension_numbers = #tpu.dot_dimension_numbers<[1], [0], [0], [1], [0, 0, 1, 1], [], []>} : vector<5x17xf32>, vector<17x1xf32>, vector<5x1xf32> -> vector<5x1xf32>
    %c0_151 = arith.constant 0 : index
    %c0_152 = arith.constant 0 : index
    %c0_153 = arith.constant 0 : index
    %144 = vector.load %arg3[%c0_151, %c0_152, %c0_153] : memref<1x5x1xf32, #tpu.memory_space<vmem>>, vector<1x5x1xf32>
    %145 = vector.shape_cast %144 : vector<1x5x1xf32> to vector<5x1xf32>
    %146 = vector.shape_cast %143 : vector<5x1xf32> to vector<1x5x1xf32>
    tpu.vector_store %arg3[%c0_151, %c0_152, %c0_153], %146 {strides = array<i32>} : memref<1x5x1xf32, #tpu.memory_space<vmem>>, vector<1x5x1xf32>,
    return
  }
  func.func @transform_0(%arg0: i32) -> (i32, i32, i32) {
    %c0_i32 = arith.constant 0 : i32
    %c0_i32_0 = arith.constant 0 : i32
    %c0_i32_1 = arith.constant 0 : i32
    return %arg0, %c0_i32, %c0_i32_0 : i32, i32, i32
  }
  func.func @transform_1(%arg0: i32) -> (i32, i32) {
    %c0_i32 = arith.constant 0 : i32
    %c0_i32_0 = arith.constant 0 : i32
    %c0_i32_1 = arith.constant 0 : i32
    return %c0_i32, %c0_i32_0 : i32, i32
  }
  func.func @transform_2(%arg0: i32) -> (i32, i32, i32) {
    %c0_i32 = arith.constant 0 : i32
    %c0_i32_0 = arith.constant 0 : i32
    %c0_i32_1 = arith.constant 0 : i32
    return %arg0, %c0_i32, %c0_i32_0 : i32, i32, i32
  }
}

</mosaic_0001>

<bundles_post_ra>
// kernel: classifier_forward.1
= control target key start
LH: loop header
LB: loop body
LE: loop exit
PB: predicated region body
PF: predicated region fallthrough
CT: control target
= control target key end

     0   :  { %s1148_s9 = smov 0   ;;  %s1399_s0 = inlined_call_operand.vmem [shape: f32[2,4,16], index: 0, kind: input, shape index: {}]   ;;  %s1400_s1 = inlined_call_operand.vmem [shape: f32[216,49], index: 1, kind: input, shape index: {}]   ;;  %s1401_s2 = inlined_call_operand.vmem [shape: f32[2,5,1], index: 2, kind: output, shape index: {}]  }
   0x1 LB: > { %s979_s10 = sadd.s32 4294967295, %s1125_s9   ;;  %p983_p0 = scmp.ge.s32.totalorder %s1125_s9, 1  ;;  %s1125_s9 = sphi %s1148_s9, %s12_s9  }
   0x2   : > { %p111_p1 = scmp.lt.s32.totalorder %s1125_s9, 3 }
   0x4   : > { %p112_p2 = pnand %p983_p0, %p111_p1 }
   0x5   : > { %p131_p3 = scmp.lt.s32.totalorder (!%p112_p2), %s979_s10, 1  ;;  %s1128_s15 = smov (!%p112_p2), 1  }
   0x6   : > { %115 = sbr.rel (%p112_p2) target bundleno = 5343 (0x14df), region = 28  ;;  %s1129_s16 = smov (!%p112_p2), 126  }
   0x7   : > { %s1130_s17 = smov (!%p112_p2), 127   ;;  %s1132_s21 = smov (!%p112_p2), 125  }
   0xb   : > { %vm139_vm0 = vcmask 146432   ;;  %v1127_v0 = vmov 0.0   ;;  %s1403_s10 = smov (!%p131_p3, %s979_s10), 1  ;;  %vm147_vm1 = vcmask 134152   ;;  %vm160_vm2 = vcmask 1043456   ;;  %v149_v8 = vld [vmem:[%s1400_s1] sm:$0xff] }
   0xc   : > { %140 = vst.msk [vmem:[#allocation2] sm:$0xff] %vm139_vm0, %v1127_v0  ;;  %s984_s11 = sshll.u32 %s1403_s10, 2  ;;  %vm170_vm3 = vcmask 1044480   ;;  %vm163_vm4 = vcmask 105472   ;;  %vm217_vm5 = vcmask 1040384   ;;  %v1131_v12 = vmov 1.0  }
   0xd   : > { %141 = vst.msk [vmem:[#allocation2 + $0x8] sm:$0xff] %vm139_vm0, %v1127_v0  ;;  %s134_s14 = scalar_lea.vmem %s1399_s0, %s984_s11  ;;  %989 = vmatpush.msk.msra.mxu1 %vm217_vm5, %v1131_v12  ;;  %991 = vmatpush.msk.msra.mxu2 %vm217_vm5, %v1131_v12  ;;  %vm202_vm6 = vcmask 138248   ;;  %v150_v15 = vld [vmem:[%s1400_s1 + $0x8] sm:$0xff]  ;;  %v204_v18 = vld [vmem:[%s1400_s1 + $0x10] sm:$0xff]  ;;  %vm213_vm7 = vcmask 203776   ;;  %v248_v27 = vld [vmem:[%s1400_s1 + $0x18] sm:$0xff] }
   0xe   : > { %356 = vst.msk [vmem:[#allocation2 + $0x8] sm:$0xff] %vm139_vm0, %v1127_v0  ;;  %v142_v1 = vld [vmem:[%s134_s14] sm:$0xf]  ;;  %993 = vmatpush.msk.msra.mxu3 %vm217_vm5, %v1131_v12  ;;  %v326_v35 = vld [vmem:[%s1400_s1 + $0x30] sm:$0x7f]  ;;  %vm331_vm8 = vcmask 1046528  }
   0xf   : > { %144 = vrot.lane.b32.xlu0 %v142_v1, %s1128_s15  ;;  %v286_v34 = vld [vmem:[%s1400_s1 + $0x20] sm:$0xff]  ;;  %v325_v39 = vld [vmem:[%s1400_s1 + $0x28] sm:$0xff]  ;;  %vm327_vm9 = vcmask 121856   ;;  %vm361_vm10 = vcmask 72712   ;;  %v363_v47 = vld [vmem:[%s1400_s1 + $0x38] sm:$0xff]  ;;  %vm446_vm11 = vcmask 400384  }
  0x10   : > { %v364_v48 = vld [vmem:[%s1400_s1 + $0x40] sm:$0xff]  ;;  %v365_v58 = vld [vmem:[%s1400_s1 + $0x48] sm:$0xff]  ;;  %v366_v59 = vld [vmem:[%s1400_s1 + $0x50] sm:$0xff]  ;;  %vm611_vm12 = vcmask 56320   ;;  %vm654_vm13 = vcmask 39944   ;;  %vm898_vm14 = vcmask 138240  }
  0x11   : > { %s985_s24 = sshll.u32 %s1403_s10, 3  ;;  %vm924_vm15 = vcmask 4096  }
  0x12   : > { %s138_s27 = scalar_lea.vmem %s1401_s2, %s985_s24 }
  0x81   : > { %v145_v2 = vpop.permute.xlu0 %144 }
  0x82   : > { %148 = vst.msk [vmem:[#allocation2] sm:$0xf] %vm147_vm1, %v145_v2 }
  0x89   : > { %v151_v3 = vld [vmem:[#allocation2] sm:$0xf] }
  0x8a   : > { %157 = vrot.lane.b32.xlu0 %v151_v3, %s1129_s16  ;;  %v153_v4 = vrot.slane %v151_v3, 4 }
  0x8c   : > { %154 = vrot.lane.b32.xlu1 %v153_v4, %s1130_s17  ;;  %v429_v4 = vld [vmem:[%s1400_s1 + $0x60] sm:$0xff] }
  0xfc   : > { %v158_v5 = vpop.permute.xlu0 %157 }
  0xfd   : > { %v162_v6 = vsel %vm160_vm2, %v158_v5, 1.0 }
  0xfe   : > { %986 = vmatpush.msk.msra.mxu0 %vm170_vm3, %v162_v6  ;;  %v155_v7 = vpop.permute.xlu1 %154 }
  0xff   : > { %v161_v9 = vsel %vm160_vm2, %v151_v3, %v155_v7  ;;  %v428_v3 = vld [vmem:[%s1400_s1 + $0x58] sm:$0xff] }
 0x100   : > { %189 = vmatpush.msra.mxu0 %v161_v9 }
 0x101   : > { %987 = vmatmul.msk.f32.vlgmr.msra.gmra.mxu0 %vm163_vm4, %v149_v8 }
 0x102   : > { %1002 = vmatpush.msk.msrb.mxu0 %vm217_vm5, %v1131_v12 }
 0x109   : > { %988 = vmatmul.msk.f32.gmra.mxu0 %vm163_vm4, %v150_v15 }
 0x17e   : > { %v191_v10 = vpop.f32.mrf.mxu0 }
 0x17f   : > { %v197_v11 = vmax.f32 %v191_v10, 0.0 }
 0x181   : > { %199 = vrot.lane.b32.xlu1 %v197_v11, %s1128_s15 }
 0x186   : > { %v194_v20 = vpop.f32.mrf.mxu0 }
 0x1f3   : > { %v200_v13 = vpop.permute.xlu1 %199 }
 0x1f4   : > { %203 = vst.msk [vmem:[#allocation2] sm:$0xff] %vm202_vm6, %v200_v13 }
 0x1fb   : > { %v205_v14 = vld [vmem:[#allocation2] sm:$0xff] }
 0x1fc   : > { %210 = vrot.lane.b32.xlu2 %v205_v14, %s1129_s16 }
 0x204   : > { %207 = vrot.lane.b32.xlu2 %v205_v14, %s1130_s17 }
 0x256   : > { %v211_v16 = vpop.permute.xlu2 %210 }
 0x257   : > { %234 = vmatpush.msra.mxu1 %v211_v16 }
 0x25e   : > { %v208_v17 = vpop.permute.xlu2 %207 }
 0x25f   : > { %235 = vmatpush.msra.mxu1 %v208_v17 }
 0x261   : > { %236 = vmatpush.msra.mxu1 %v205_v14 }
 0x262   : > { %990 = vmatmul.msk.f32.vlgmr.msra.gmra.mxu1 %vm213_vm7, %v204_v18 }
 0x263   : > { %995 = vmatpush.msk.msrb.mxu1 %vm331_vm8, %v326_v35 }
 0x265   : > { %350 = vmatpush.msrb.mxu1 %v325_v39 }
 0x267   : > { %1008 = vmatpush.msk.msra.mxu1 %vm217_vm5, %v1131_v12 }
 0x2df   : > { %v238_v19 = vpop.f32.mrf.mxu1 }
 0x2e0   : > { %v241_v21 = vmax.f32 %v238_v19, 0.0 }
 0x2e2   : > { %v242_v22 = vadd.f32 %v241_v21, %v194_v20 }
 0x2e4   : > { %244 = vrot.lane.b32.xlu0 %v242_v22, %s1128_s15 }
 0x356   : > { %v245_v23 = vpop.permute.xlu0 %244 }
 0x357   : > { %247 = vst.msk [vmem:[#allocation2] sm:$0xff] %vm202_vm6, %v245_v23 }
 0x35e   : > { %v249_v24 = vld [vmem:[#allocation2] sm:$0xff] }
 0x35f   : > { %251 = vrot.lane.b32.xlu2 %v249_v24, %s1130_s17  ;;  %254 = vrot.lane.b32.xlu1 %v249_v24, %s1129_s16 }
 0x3b9   : > { %v252_v26 = vpop.permute.xlu2 %251 }
 0x3d1   : > { %v255_v25 = vpop.permute.xlu1 %254 }
 0x3d2   : > { %273 = vmatpush.msra.mxu2 %v255_v25  ;;  %v490_v25 = vld [vmem:[%s1400_s1 + $0x68] sm:$0xff] }
 0x3d4   : > { %274 = vmatpush.msra.mxu2 %v252_v26  ;;  %v491_v26 = vld [vmem:[%s1400_s1 + $0x70] sm:$0xff] }
 0x3d6   : > { %275 = vmatpush.msra.mxu2 %v249_v24 }
 0x3d7   : > { %992 = vmatmul.msk.f32.vlgmr.msra.gmra.mxu2 %vm213_vm7, %v248_v27 }
 0x3d8   : > { %997 = vmatpush.msk.msrb.mxu2 %vm217_vm5, %v1131_v12 }
 0x45a   : > { %v277_v28 = vpop.f32.mrf.mxu2 }
 0x45b   : > { %v280_v29 = vmax.f32 %v277_v28, 0.0 }
 0x45d   : > { %282 = vrot.lane.b32.xlu0 %v280_v29, %s1128_s15 }
 0x4cf   : > { %v283_v30 = vpop.permute.xlu0 %282 }
 0x4d0   : > { %285 = vst.msk [vmem:[#allocation2] sm:$0xff] %vm202_vm6, %v283_v30 }
 0x4d7   : > { %v287_v31 = vld [vmem:[#allocation2] sm:$0xff] }
 0x4d8   : > { %289 = vrot.lane.b32.xlu2 %v287_v31, %s1130_s17  ;;  %355 = vst.msk [vmem:[#allocation2] sm:$0xff] %vm139_vm0, %v1127_v0  ;;  %292 = vrot.lane.b32.xlu1 %v287_v31, %s1129_s16 }
 0x532   : > { %v290_v33 = vpop.permute.xlu2 %289 }
 0x54a   : > { %v293_v32 = vpop.permute.xlu1 %292 }
 0x54b   : > { %311 = vmatpush.msra.mxu3 %v293_v32 }
 0x54d   : > { %312 = vmatpush.msra.mxu3 %v290_v33 }
 0x54f   : > { %313 = vmatpush.msra.mxu3 %v287_v31 }
 0x550   : > { %994 = vmatmul.msk.f32.vlgmr.msra.gmra.mxu3 %vm213_vm7, %v286_v34 }
 0x551   : > { %1005 = vmatpush.msk.msrb.mxu3 %vm217_vm5, %v1131_v12 }
 0x5d3   : > { %v315_v36 = vpop.f32.mrf.mxu3 }
 0x5d4   : > { %v318_v37 = vmax.f32 %v315_v36, 0.0 }
 0x5d6   : > { %v319_v38 = vadd.f32 %v318_v37, %v242_v22 }
 0x5d8   : > { %321 = vrot.lane.b32.xlu0 %v319_v38, %s1130_s17 }
 0x64a   : > { %v322_v40 = vpop.permute.xlu0 %321 }
 0x64b   : > { %v324_v41 = vmax.f32 %v319_v38, %v322_v40 }
 0x64d   : > { %996 = vmatmul.msk.f32.vlgmr.msrb.gmra.mxu1 %vm327_vm9, %v324_v41 }
 0x6ca   : > { %v352_v42 = vpop.f32.mrf.mxu1 }
 0x6cb   : > { %358 = vrot.lane.b32.xlu1 %v352_v42, %s1128_s15  ;;  %v549_v42 = vld [vmem:[%s1400_s1 + $0x78] sm:$0xff] }
 0x73d   : > { %v359_v43 = vpop.permute.xlu1 %358 }
 0x73e   : > { %362 = vst.msk [vmem:[#allocation2] sm:$0xff] %vm361_vm10, %v359_v43 }
 0x745   : > { %v367_v44 = vld [vmem:[#allocation2] sm:$0xff] }
 0x746   : > { %369 = vrot.lane.b32.xlu0 %v367_v44, %s1130_s17  ;;  %372 = vrot.lane.b32.xlu2 %v367_v44, %s1129_s16 }
 0x7a0   : > { %v373_v45 = vpop.permute.xlu2 %372 }
 0x7a1   : > { %400 = vmatpush.msrb.mxu2 %v373_v45 }
 0x7b8   : > { %v370_v46 = vpop.permute.xlu0 %369 }
 0x7b9   : > { %401 = vmatpush.msrb.mxu2 %v370_v46 }
 0x7bb   : > { %402 = vmatpush.msrb.mxu2 %v367_v44 }
 0x7bc   : > { %998 = vmatmul.msk.f32.vlgmr.msrb.gmra.mxu2 %vm213_vm7, %v363_v47 }
 0x7bd   : > { %1020 = vmatpush.msk.msra.mxu2 %vm217_vm5, %v1131_v12 }
 0x7c4   : > { %999 = vmatmul.msk.f32.gmra.mxu2 %vm213_vm7, %v364_v48 }
 0x7cc   : > { %1000 = vmatmul.msk.f32.gmra.mxu2 %vm213_vm7, %v365_v58 }
 0x7d4   : > { %1001 = vmatmul.msk.f32.gmra.mxu2 %vm213_vm7, %v366_v59 }
 0x83f   : > { %v404_v49 = vpop.f32.mrf.mxu2 }
 0x840   : > { %v416_v50 = vmax.f32 %v404_v49, 0.0  ;;  %v610_v49 = vld [vmem:[%s1400_s1 + $0x88] sm:$0x7f] }
 0x842   : > { %420 = vrot.lane.b32.xlu2 %v416_v50, %s1128_s15 }
 0x847   : > { %v407_v51 = vpop.f32.mrf.mxu2 }
 0x848   : > { %v417_v52 = vmax.f32 %v407_v51, 0.0 }
 0x84a   : > { %422 = vrot.lane.b32.xlu1 %v417_v52, %s1128_s15 }
 0x84f   : > { %v410_v6 = vpop.f32.mrf.mxu2 }
 0x857   : > { %v413_v10 = vpop.f32.mrf.mxu2 }
 0x89c   : > { %v421_v53 = vpop.permute.xlu2 %420 }
 0x89d   : > { %426 = vst.msk [vmem:[#allocation2] sm:$0xff] %vm361_vm10, %v421_v53 }
 0x8a4   : > { %v430_v55 = vld [vmem:[#allocation2] sm:$0xff] }
 0x8bc   : > { %v423_v54 = vpop.permute.xlu1 %422 }
 0x8bd   : > { %427 = vst.msk [vmem:[#allocation2 + $0x8] sm:$0xff] %vm361_vm10, %v423_v54 }
 0x8c4   : > { %v431_v56 = vld [vmem:[#allocation2 + $0x8] sm:$0xff] }
 0x8c5   : > { %v1049_v57 = vpack.i.bf16 %v430_v55, %v431_v56 }
 0x8c7   : > { %1050 = vrot.lane.b32.xlu1 %v1049_v57, %s1130_s17  ;;  %1045 = vrot.lane.b32.xlu0 %v1049_v57, %s1129_s16 }
 0x939   : > { %v1046_v60 = vpop.permute.xlu0 %1045  ;;  %v1051_v62 = vpop.permute.xlu1 %1050 }
 0x93a   : > { %v1047_v61 = vunpack.i.l.bf16 %v1046_v60  ;;  %v1048_v63 = vunpack.i.h.bf16 %v1046_v60  ;;  %v1052_v1 = vunpack.i.l.bf16 %v1051_v62  ;;  %v1053_v2 = vunpack.i.h.bf16 %v1051_v62 }
 0x93c   : > { %463 = vmatpush.msrb.mxu0 %v1047_v61 }
 0x93e   : > { %464 = vmatpush.msrb.mxu0 %v1048_v63 }
 0x940   : > { %465 = vmatpush.msrb.mxu0 %v1052_v1 }
 0x942   : > { %466 = vmatpush.msrb.mxu0 %v1053_v2 }
 0x944   : > { %467 = vmatpush.msrb.mxu0 %v431_v56 }
 0x946   : > { %468 = vmatpush.msrb.mxu0 %v430_v55 }
 0x947   : > { %1003 = vmatmul.msk.f32.vlgmr.msrb.gmra.mxu0 %vm446_vm11, %v428_v3 }
 0x948   : > { %1011 = vmatpush.msk.msra.mxu0 %vm331_vm8, %v610_v49 }
 0x94a   : > { %1023 = vmatpush.msk.msrb.mxu0 %vm217_vm5, %v1131_v12 }
 0x94f   : > { %1004 = vmatmul.msk.f32.gmra.mxu0 %vm446_vm11, %v429_v4  ;;  %v657_v4 = vld [vmem:[%s1400_s1 + $0x90] sm:$0xff] }
 0x9c4   : > { %v470_v5 = vpop.f32.mrf.mxu0 }
 0x9c5   : > { %v476_v7 = vmax.f32 %v470_v5, 0.0  ;;  %v658_v5 = vld [vmem:[%s1400_s1 + $0x98] sm:$0xff] }
 0x9c7   : > { %v1263_v8 = vadd.f32 %v476_v7, %v410_v6 }
 0x9c9   : > { %482 = vrot.lane.b32.xlu0 %v1263_v8, %s1128_s15 }
 0x9cc   : > { %v473_v9 = vpop.f32.mrf.mxu0 }
 0x9cd   : > { %v477_v11 = vmax.f32 %v473_v9, 0.0 }
 0x9cf   : > { %v1267_v13 = vadd.f32 %v477_v11, %v413_v10 }
 0x9d1   : > { %484 = vrot.lane.b32.xlu2 %v1267_v13, %s1128_s15 }
 0xa2b   : > { %v485_v14 = vpop.permute.xlu2 %484 }
 0xa2c   : > { %489 = vst.msk [vmem:[#allocation2 + $0x8] sm:$0xff] %vm361_vm10, %v485_v14 }
 0xa33   : > { %v493_v16 = vld [vmem:[#allocation2 + $0x8] sm:$0xff] }
 0xa3b   : > { %v483_v15 = vpop.permute.xlu0 %482 }
 0xa3c   : > { %488 = vst.msk [vmem:[#allocation2] sm:$0xff] %vm361_vm10, %v483_v15 }
 0xa43   : > { %v492_v17 = vld [vmem:[#allocation2] sm:$0xff] }
 0xa44   : > { %v1059_v18 = vpack.i.bf16 %v492_v17, %v493_v16 }
 0xa46   : > { %1060 = vrot.lane.b32.xlu2 %v1059_v18, %s1130_s17  ;;  %1055 = vrot.lane.b32.xlu1 %v1059_v18, %s1129_s16 }
 0xaa0   : > { %v1061_v21 = vpop.permute.xlu2 %1060 }
 0xaa1   : > { %v1062_v23 = vunpack.i.l.bf16 %v1061_v21  ;;  %v1063_v24 = vunpack.i.h.bf16 %v1061_v21 }
 0xab8   : > { %v1056_v19 = vpop.permute.xlu1 %1055 }
 0xab9   : > { %v1057_v20 = vunpack.i.l.bf16 %v1056_v19  ;;  %v1058_v22 = vunpack.i.h.bf16 %v1056_v19 }
 0xabb   : > { %524 = vmatpush.msrb.mxu3 %v1057_v20 }
 0xabd   : > { %525 = vmatpush.msrb.mxu3 %v1058_v22  ;;  %v716_v22 = vld [vmem:[%s1400_s1 + $0xa0] sm:$0xff] }
 0xabf   : > { %526 = vmatpush.msrb.mxu3 %v1062_v23  ;;  %v717_v23 = vld [vmem:[%s1400_s1 + $0xa8] sm:$0xff] }
 0xac1   : > { %527 = vmatpush.msrb.mxu3 %v1063_v24 }
 0xac3   : > { %528 = vmatpush.msrb.mxu3 %v493_v16 }
 0xac5   : > { %529 = vmatpush.msrb.mxu3 %v492_v17 }
 0xac6   : > { %1006 = vmatmul.msk.f32.vlgmr.msrb.gmra.mxu3 %vm446_vm11, %v490_v25 }
 0xac7   : > { %1014 = vmatpush.msk.msra.mxu3 %vm217_vm5, %v1131_v12 }
 0xace   : > { %1007 = vmatmul.msk.f32.gmra.mxu3 %vm446_vm11, %v491_v26 }
 0xb49   : > { %v531_v27 = vpop.f32.mrf.mxu3 }
 0xb4a   : > { %v537_v28 = vmax.f32 %v531_v27, 0.0 }
 0xb4c   : > { %541 = vrot.lane.b32.xlu1 %v537_v28, %s1128_s15 }
 0xb51   : > { %v534_v29 = vpop.f32.mrf.mxu3 }
 0xb52   : > { %v538_v30 = vmax.f32 %v534_v29, 0.0 }
 0xb54   : > { %543 = vrot.lane.b32.xlu0 %v538_v30, %s1128_s15 }
 0xbbe   : > { %v542_v31 = vpop.permute.xlu1 %541 }
 0xbbf   : > { %547 = vst.msk [vmem:[#allocation2] sm:$0xff] %vm361_vm10, %v542_v31 }
 0xbc6   : > { %v544_v32 = vpop.permute.xlu0 %543  ;;  %v551_v33 = vld [vmem:[#allocation2] sm:$0xff] }
 0xbc7   : > { %548 = vst.msk [vmem:[#allocation2 + $0x8] sm:$0xff] %vm361_vm10, %v544_v32 }
 0xbc8   : > { %644 = vst.msk [vmem:[#allocation2] sm:$0xff] %vm139_vm0, %v1127_v0 }
 0xbce   : > { %v552_v34 = vld [vmem:[#allocation2 + $0x8] sm:$0xff] }
 0xbcf   : > { %v1069_v35 = vpack.i.bf16 %v551_v33, %v552_v34  ;;  %645 = vst.msk [vmem:[#allocation2 + $0x8] sm:$0xff] %vm139_vm0, %v1127_v0  ;;  %v550_v0 = vld [vmem:[%s1400_s1 + $0x80] sm:$0xff] }
 0xbd1   : > { %1070 = vrot.lane.b32.xlu0 %v1069_v35, %s1130_s17  ;;  %1065 = vrot.lane.b32.xlu2 %v1069_v35, %s1129_s16 }
 0xc2b   : > { %v1066_v36 = vpop.permute.xlu2 %1065 }
 0xc2c   : > { %v1067_v37 = vunpack.i.l.bf16 %v1066_v36  ;;  %v1068_v38 = vunpack.i.h.bf16 %v1066_v36 }
 0xc2e   : > { %583 = vmatpush.msra.mxu1 %v1067_v37 }
 0xc30   : > { %584 = vmatpush.msra.mxu1 %v1068_v38 }
 0xc43   : > { %v1071_v39 = vpop.permute.xlu0 %1070 }
 0xc44   : > { %v1072_v40 = vunpack.i.l.bf16 %v1071_v39  ;;  %v1073_v41 = vunpack.i.h.bf16 %v1071_v39 }
 0xc46   : > { %585 = vmatpush.msra.mxu1 %v1072_v40 }
 0xc48   : > { %586 = vmatpush.msra.mxu1 %v1073_v41  ;;  %v777_v41 = vld [vmem:[%s1400_s1 + $0xb0] sm:$0xff] }
 0xc4a   : > { %587 = vmatpush.msra.mxu1 %v552_v34 }
 0xc4c   : > { %588 = vmatpush.msra.mxu1 %v551_v33 }
 0xc4d   : > { %1009 = vmatmul.msk.f32.vlgmr.msra.gmra.mxu1 %vm446_vm11, %v549_v42  ;;  %v778_v42 = vld [vmem:[%s1400_s1 + $0xb8] sm:$0xff] }
 0xc4e   : > { %1017 = vmatpush.msk.msrb.mxu1 %vm217_vm5, %v1131_v12 }
 0xc55   : > { %1010 = vmatmul.msk.f32.gmra.mxu1 %vm446_vm11, %v550_v0 }
 0xcca   : > { %v590_v43 = vpop.f32.mrf.mxu1 }
 0xccb   : > { %v596_v44 = vmax.f32 %v590_v43, 0.0 }
 0xccd   : > { %v598_v45 = vadd.f32 %v596_v44, %v1263_v8 }
 0xccf   : > { %602 = vrot.lane.b32.xlu1 %v598_v45, %s1130_s17 }
 0xcd2   : > { %v593_v46 = vpop.f32.mrf.mxu1 }
 0xcd3   : > { %v597_v47 = vmax.f32 %v593_v46, 0.0 }
 0xcd5   : > { %v599_v48 = vadd.f32 %v597_v47, %v1267_v13 }
 0xcd7   : > { %604 = vrot.lane.b32.xlu2 %v599_v48, %s1130_s17 }
 0xd31   : > { %v605_v52 = vpop.permute.xlu2 %604 }
 0xd32   : > { %v609_v53 = vmax.f32 %v599_v48, %v605_v52 }
 0xd41   : > { %v603_v50 = vpop.permute.xlu1 %602 }
 0xd42   : > { %v608_v51 = vmax.f32 %v598_v45, %v603_v50 }
 0xd44   : > { %1012 = vmatmul.msk.f32.vlgmr.msra.gmra.mxu0 %vm611_vm12, %v608_v51 }
 0xd4c   : > { %1013 = vmatmul.msk.f32.gmra.mxu0 %vm611_vm12, %v609_v53 }
 0xdc1   : > { %v1315_v54 = vpop.f32.mrf.mxu0 }
 0xdc2   : > { %648 = vrot.lane.b32.xlu1 %v1315_v54, %s1128_s15 }
 0xdc9   : > { %v1319_v55 = vpop.f32.mrf.mxu0 }
 0xdca   : > { %650 = vrot.lane.b32.xlu0 %v1319_v55, %s1128_s15 }
 0xe34   : > { %v649_v56 = vpop.permute.xlu1 %648 }
 0xe35   : > { %655 = vst.msk [vmem:[#allocation2] sm:$0xff] %vm654_vm13, %v649_v56 }
 0xe3c   : > { %v651_v57 = vpop.permute.xlu0 %650  ;;  %v659_v58 = vld [vmem:[#allocation2] sm:$0xff] }
 0xe3d   : > { %656 = vst.msk [vmem:[#allocation2 + $0x8] sm:$0xff] %vm654_vm13, %v651_v57  ;;  %v836_v57 = vld [vmem:[%s1400_s1 + $0xc0] sm:$0xff] }
 0xe44   : > { %v660_v59 = vld [vmem:[#allocation2 + $0x8] sm:$0xff] }
 0xe45   : > { %v1079_v60 = vpack.i.bf16 %v659_v58, %v660_v59 }
 0xe47   : > { %1080 = vrot.lane.b32.xlu0 %v1079_v60, %s1130_s17  ;;  %1075 = vrot.lane.b32.xlu2 %v1079_v60, %s1129_s16 }
 0xea1   : > { %v1076_v61 = vpop.permute.xlu2 %1075 }
 0xea2   : > { %v1077_v62 = vunpack.i.l.bf16 %v1076_v61  ;;  %v1078_v63 = vunpack.i.h.bf16 %v1076_v61 }
 0xea4   : > { %691 = vmatpush.msra.mxu3 %v1077_v62 }
 0xea6   : > { %692 = vmatpush.msra.mxu3 %v1078_v63 }
 0xeb9   : > { %v1081_v1 = vpop.permute.xlu0 %1080 }
 0xeba   : > { %v1082_v2 = vunpack.i.l.bf16 %v1081_v1  ;;  %v1083_v3 = vunpack.i.h.bf16 %v1081_v1 }
 0xebc   : > { %693 = vmatpush.msra.mxu3 %v1082_v2 }
 0xebe   : > { %694 = vmatpush.msra.mxu3 %v1083_v3 }
 0xec0   : > { %695 = vmatpush.msra.mxu3 %v660_v59 }
 0xec2   : > { %696 = vmatpush.msra.mxu3 %v659_v58  ;;  %v837_v58 = vld [vmem:[%s1400_s1 + $0xc8] sm:$0xff] }
 0xec3   : > { %1015 = vmatmul.msk.f32.vlgmr.msra.gmra.mxu3 %vm446_vm11, %v657_v4 }
 0xecb   : > { %1016 = vmatmul.msk.f32.gmra.mxu3 %vm446_vm11, %v658_v5 }
 0xf46   : > { %v698_v6 = vpop.f32.mrf.mxu3 }
 0xf47   : > { %v704_v7 = vmax.f32 %v698_v6, 0.0  ;;  %v887_v6 = vld [vmem:[%s1400_s1 + $0xd0] sm:$0x1f] }
 0xf49   : > { %708 = vrot.lane.b32.xlu2 %v704_v7, %s1128_s15 }
 0xf4e   : > { %v701_v8 = vpop.f32.mrf.mxu3 }
 0xf4f   : > { %v705_v9 = vmax.f32 %v701_v8, 0.0 }
 0xf51   : > { %710 = vrot.lane.b32.xlu1 %v705_v9, %s1128_s15 }
 0xfa3   : > { %v709_v10 = vpop.permute.xlu2 %708 }
 0xfa4   : > { %714 = vst.msk [vmem:[#allocation2] sm:$0xff] %vm654_vm13, %v709_v10 }
 0xfab   : > { %v718_v13 = vld [vmem:[#allocation2] sm:$0xff] }
 0xfc3   : > { %v711_v11 = vpop.permute.xlu1 %710 }
 0xfc4   : > { %715 = vst.msk [vmem:[#allocation2 + $0x8] sm:$0xff] %vm654_vm13, %v711_v11 }
 0xfcb   : > { %v719_v14 = vld [vmem:[#allocation2 + $0x8] sm:$0xff] }
 0xfcc   : > { %v1089_v15 = vpack.i.bf16 %v718_v13, %v719_v14 }
 0xfce   : > { %1090 = vrot.lane.b32.xlu1 %v1089_v15, %s1130_s17  ;;  %1085 = vrot.lane.b32.xlu0 %v1089_v15, %s1129_s16 }
0x1040   : > { %v1086_v16 = vpop.permute.xlu0 %1085  ;;  %v1091_v18 = vpop.permute.xlu1 %1090 }
0x1041   : > { %v1087_v17 = vunpack.i.l.bf16 %v1086_v16  ;;  %v1088_v19 = vunpack.i.h.bf16 %v1086_v16  ;;  %v1092_v20 = vunpack.i.l.bf16 %v1091_v18  ;;  %v1093_v21 = vunpack.i.h.bf16 %v1091_v18 }
0x1043   : > { %750 = vmatpush.msrb.mxu1 %v1087_v17 }
0x1045   : > { %751 = vmatpush.msrb.mxu1 %v1088_v19 }
0x1047   : > { %752 = vmatpush.msrb.mxu1 %v1092_v20 }
0x1049   : > { %753 = vmatpush.msrb.mxu1 %v1093_v21 }
0x104b   : > { %754 = vmatpush.msrb.mxu1 %v719_v14 }
0x104d   : > { %755 = vmatpush.msrb.mxu1 %v718_v13 }
0x104e   : > { %1018 = vmatmul.msk.f32.vlgmr.msrb.gmra.mxu1 %vm446_vm11, %v716_v22 }
0x1056   : > { %1019 = vmatmul.msk.f32.gmra.mxu1 %vm446_vm11, %v717_v23 }
0x10cb   : > { %v757_v24 = vpop.f32.mrf.mxu1 }
0x10cc   : > { %v763_v25 = vmax.f32 %v757_v24, 0.0 }
0x10ce   : > { %v1350_v26 = vadd.f32 %v763_v25, %v1315_v54 }
0x10d0   : > { %769 = vrot.lane.b32.xlu0 %v1350_v26, %s1128_s15 }
0x10d3   : > { %v760_v27 = vpop.f32.mrf.mxu1 }
0x10d4   : > { %v764_v28 = vmax.f32 %v760_v27, 0.0 }
0x10d6   : > { %v1355_v29 = vadd.f32 %v764_v28, %v1319_v55 }
0x10d8   : > { %771 = vrot.lane.b32.xlu2 %v1355_v29, %s1128_s15 }
0x1132   : > { %v772_v30 = vpop.permute.xlu2 %771 }
0x1133   : > { %776 = vst.msk [vmem:[#allocation2 + $0x8] sm:$0xff] %vm654_vm13, %v772_v30 }
0x113a   : > { %v780_v33 = vld [vmem:[#allocation2 + $0x8] sm:$0xff] }
0x1142   : > { %v770_v31 = vpop.permute.xlu0 %769 }
0x1143   : > { %775 = vst.msk [vmem:[#allocation2] sm:$0xff] %vm654_vm13, %v770_v31 }
0x114a   : > { %v779_v32 = vld [vmem:[#allocation2] sm:$0xff] }
0x114b   : > { %v1099_v34 = vpack.i.bf16 %v779_v32, %v780_v33 }
0x114d   : > { %1100 = vrot.lane.b32.xlu2 %v1099_v34, %s1130_s17  ;;  %1095 = vrot.lane.b32.xlu1 %v1099_v34, %s1129_s16 }
0x11a7   : > { %v1101_v37 = vpop.permute.xlu2 %1100 }
0x11a8   : > { %v1102_v39 = vunpack.i.l.bf16 %v1101_v37  ;;  %v1103_v40 = vunpack.i.h.bf16 %v1101_v37 }
0x11bf   : > { %v1096_v35 = vpop.permute.xlu1 %1095 }
0x11c0   : > { %v1097_v36 = vunpack.i.l.bf16 %v1096_v35  ;;  %v1098_v38 = vunpack.i.h.bf16 %v1096_v35 }
0x11c2   : > { %811 = vmatpush.msra.mxu2 %v1097_v36 }
0x11c4   : > { %812 = vmatpush.msra.mxu2 %v1098_v38 }
0x11c6   : > { %813 = vmatpush.msra.mxu2 %v1102_v39 }
0x11c8   : > { %814 = vmatpush.msra.mxu2 %v1103_v40 }
0x11ca   : > { %815 = vmatpush.msra.mxu2 %v780_v33 }
0x11cc   : > { %816 = vmatpush.msra.mxu2 %v779_v32 }
0x11cd   : > { %1021 = vmatmul.msk.f32.vlgmr.msra.gmra.mxu2 %vm446_vm11, %v777_v41 }
0x11d5   : > { %1022 = vmatmul.msk.f32.gmra.mxu2 %vm446_vm11, %v778_v42 }
0x1250   : > { %v818_v0 = vpop.f32.mrf.mxu2 }
0x1251   : > { %v824_v43 = vmax.f32 %v818_v0, 0.0 }
0x1253   : > { %828 = vrot.lane.b32.xlu1 %v824_v43, %s1128_s15 }
0x1258   : > { %v821_v44 = vpop.f32.mrf.mxu2 }
0x1259   : > { %v825_v45 = vmax.f32 %v821_v44, 0.0 }
0x125b   : > { %830 = vrot.lane.b32.xlu0 %v825_v45, %s1128_s15 }
0x12c5   : > { %v829_v46 = vpop.permute.xlu1 %828 }
0x12c6   : > { %834 = vst.msk [vmem:[#allocation2] sm:$0xff] %vm654_vm13, %v829_v46 }
0x12cd   : > { %v831_v47 = vpop.permute.xlu0 %830  ;;  %v838_v48 = vld [vmem:[#allocation2] sm:$0xff] }
0x12ce   : > { %835 = vst.msk [vmem:[#allocation2 + $0x8] sm:$0xff] %vm654_vm13, %v831_v47 }
0x12d5   : > { %v839_v49 = vld [vmem:[#allocation2 + $0x8] sm:$0xff] }
0x12d6   : > { %v1109_v50 = vpack.i.bf16 %v838_v48, %v839_v49 }
0x12d8   : > { %1110 = vrot.lane.b32.xlu0 %v1109_v50, %s1130_s17  ;;  %1105 = vrot.lane.b32.xlu2 %v1109_v50, %s1129_s16 }
0x1332   : > { %v1106_v51 = vpop.permute.xlu2 %1105 }
0x1333   : > { %v1107_v52 = vunpack.i.l.bf16 %v1106_v51  ;;  %v1108_v53 = vunpack.i.h.bf16 %v1106_v51 }
0x1335   : > { %870 = vmatpush.msrb.mxu0 %v1107_v52 }
0x1337   : > { %871 = vmatpush.msrb.mxu0 %v1108_v53 }
0x134a   : > { %v1111_v54 = vpop.permute.xlu0 %1110 }
0x134b   : > { %v1112_v55 = vunpack.i.l.bf16 %v1111_v54  ;;  %v1113_v56 = vunpack.i.h.bf16 %v1111_v54 }
0x134d   : > { %872 = vmatpush.msrb.mxu0 %v1112_v55 }
0x134f   : > { %873 = vmatpush.msrb.mxu0 %v1113_v56 }
0x1351   : > { %874 = vmatpush.msrb.mxu0 %v839_v49 }
0x1353   : > { %875 = vmatpush.msrb.mxu0 %v838_v48 }
0x1354   : > { %1024 = vmatmul.msk.f32.vlgmr.msrb.gmra.mxu0 %vm446_vm11, %v836_v57 }
0x135c   : > { %1025 = vmatmul.msk.f32.gmra.mxu0 %vm446_vm11, %v837_v58 }
0x13d1   : > { %v877_v59 = vpop.f32.mrf.mxu0 }
0x13d2   : > { %v883_v60 = vmax.f32 %v877_v59, 0.0 }
0x13d4   : > { %v885_v61 = vadd.f32 %v883_v60, %v1350_v26 }
0x13d6   : > { %890 = vrot.lane.b32.xlu2 %v885_v61, %s1132_s21 }
0x13d9   : > { %v880_v62 = vpop.f32.mrf.mxu0 }
0x13da   : > { %v884_v63 = vmax.f32 %v880_v62, 0.0 }
0x13dc   : > { %v886_v1 = vadd.f32 %v884_v63, %v1355_v29 }
0x13de   : > { %v1114_v2 = vpack.i.bf16 %v886_v1, %v1131_v12 }
0x13e0   : > { %1115 = vrot.lane.b32.xlu1 %v1114_v2, %s1132_s21 }
0x1430   : > { %v891_v7 = vpop.permute.xlu2 %890 }
0x1452   : > { %v1116_v3 = vpop.permute.xlu1 %1115 }
0x1453   : > { %v1117_v4 = vunpack.i.l.bf16 %v1116_v3  ;;  %v1118_v5 = vunpack.i.h.bf16 %v1116_v3 }
0x1455   : > { %1026 = vmatpush.msk.msrb.mxu3 %vm217_vm5, %v1117_v4 }
0x1457   : > { %918 = vmatpush.msrb.mxu3 %v1118_v5 }
0x1459   : > { %919 = vmatpush.msrb.mxu3 %v891_v7 }
0x145a   : > { %1027 = vmatmul.msk.f32.vlgmr.msrb.gmra.mxu3 %vm898_vm14, %v887_v6 }
0x14dd   : > { %v921_v12 = vpop.f32.mrf.mxu3 }
0x14de   : > { %925 = vst.msk [vmem:[%s138_s27] sm:$0x1f] %vm924_vm15, %v921_v12 }
0x14df PF: > { %s12_s9 = sadd.s32 1, %s1125_s9  }
0x14e0   : > { %p9_p4 = scmp.ge.s32.totalorder %s12_s9, 4  }
0x14e2   :  { %11 = sbr.rel (!%p9_p4) target bundleno = 1 (0x1), region = 58 }

</bundles_post_ra>
